<compile_context>
chip_gen: v7x
topology: tpu7x:2x2x1
jax: 0.10.0
libtpu: 0.0.40
codegen_flags: <defaults>
</compile_context>

<pallas_src>
import functools

import jax
import jax.numpy as jnp
from jax import lax
from jax.experimental import pallas as pl
from jax.experimental.pallas import tpu as pltpu


def _round_up(x, m):
    return ((x + m - 1) // m) * m


def _gram_kernel(pred_ref, targ_ref, out_ref, acc_ref, *,
                 kt, tile_k, hw, need_mask, emit_partial):
    """Accumulates M = (p+t)(p-t)^T over k tiles for one (batch, split)."""
    j = pl.program_id(2)

    # Upcast BEFORE +/- so bf16 inputs do not lose bits to cancellation.
    p = pred_ref[0].astype(jnp.float32)            # (c_pad, tile_k)
    t = targ_ref[0].astype(jnp.float32)
    s = p + t
    d = p - t

    if need_mask:
        # Ragged-tail / overflow tiles: columns >= hw may contain garbage (or
        # duplicated data for a clamped block index) -- select them to 0 on
        # BOTH operands so NaN/Inf garbage cannot reach the MXU.
        split = pl.program_id(1)
        col0 = (split * kt + j) * tile_k
        cols = col0 + lax.broadcasted_iota(jnp.int32, (s.shape[0], tile_k), 1)
        valid = cols < hw
        s = jnp.where(valid, s, 0.0)
        d = jnp.where(valid, d, 0.0)

    m_part = lax.dot_general(
        s, d,
        dimension_numbers=(((1,), (1,)), ((), ())),   # contract the k axis
        preferred_element_type=jnp.float32)

    @pl.when(j == 0)
    def _():
        acc_ref[...] = m_part                  # first step: write, no RMW

    @pl.when(j > 0)
    def _():
        acc_ref[...] += m_part

    @pl.when(j == kt - 1)
    def _():
        m = acc_ref[...]
        if emit_partial:
            out_ref[0, 0] = m                  # partial M; combined in wrapper
        else:
            # gram(p) - gram(t) == 0.5 * (M + M^T)   (unscaled)
            out_ref[...] = (0.5 * jnp.sum(jnp.abs(m + m.T))).reshape(1, 1, 1)


def gram_loss(pred, target, loss_weight=1.0, tile_k=None):
    """Style (Gram) loss: loss_weight * mean(|gram(pred) - gram(target)|).

    pred, target: (N, C, H, W), float32 or bfloat16.  Returns a f32 scalar.
    """
    assert pred.shape == target.shape and pred.dtype == target.dtype
    n, c, h, w = pred.shape
    hw = h * w
    itemsize = jnp.dtype(pred.dtype).itemsize

    pred_f = pred.reshape(n, c, hw)
    targ_f = target.reshape(n, c, hw)

    # ---- channel padding: sublane multiple for the input dtype (zero rows /
    # cols contribute nothing to the Gram matrices, so the result is exact).
    sub = {4: 8, 2: 16, 1: 32}.get(itemsize, 8)
    c_pad = _round_up(c, sub)
    if c_pad != c:
        pred_f = jnp.pad(pred_f, ((0, 0), (0, c_pad - c), (0, 0)))
        targ_f = jnp.pad(targ_f, ((0, 0), (0, c_pad - c), (0, 0)))

    # ---- spatial axis: never pad to tile_k (a full-array jnp.pad would double
    # HBM traffic on a memory-bound kernel).  Only tiny inputs are padded up to
    # one 128-lane tile; ragged tails are masked in-kernel instead.
    if hw < 128:
        pred_f = jnp.pad(pred_f, ((0, 0), (0, 0), (0, 128 - hw)))
        targ_f = jnp.pad(targ_f, ((0, 0), (0, 0), (0, 128 - hw)))
        hw_p = 128
    else:
        hw_p = hw

    # ---- v7x megacore: with N == 1 the batch axis cannot feed both cores, so
    # split the HW reduction into two 'parallel' halves (partial-M outputs).
    want_split = (n == 1)

    # ---- tile_k / VMEM budget: inputs are double-buffered (2 tensors x 2
    # buffers x (c_pad, tile_k)); the (c_pad, c_pad) f32 accumulator and the
    # (double-buffered) output block are charged against the same budget so
    # the plan fits v7x's 64 MiB physical VMEM and grows on v5e/v6e (128 MiB).
    acc_bytes = c_pad * c_pad * 4
    out_buf_bytes = 2 * acc_bytes if want_split else 4096
    try:
        phys_vmem = int(getattr(pltpu.get_tpu_info(), "vmem_capacity_bytes",
                                64 << 20))
    except Exception:
        phys_vmem = 64 << 20
    total_budget = max(16 << 20, min((phys_vmem * 5) // 8, 80 << 20))
    input_budget = max(4 << 20, total_budget - acc_bytes - out_buf_bytes)
    # TODO(synk): for c_pad >= 2048 the (C,C) accumulator alone dominates a
    # v7x-friendly budget; tiling the accumulator's row dim is not implemented.

    user_tile = tile_k is not None
    if not user_tile:
        tk = input_budget // (4 * c_pad * itemsize)
        tile_k = int(max(512, min(8192, (tk // 128) * 128)))
    tile_k = int(max(128, min((int(tile_k) // 128) * 128, (hw_p // 128) * 128)))
    if not user_tile and hw_p % tile_k != 0:
        # Prefer a 128-multiple that divides hw_p (no tail masking, no wasted
        # partial tile) as long as it does not shrink the tile by more than 2x.
        for cand in range(tile_k, 127, -128):
            if hw_p % cand == 0:
                if cand * 2 >= tile_k:
                    tile_k = cand
                break

    total_k = -(-hw_p // tile_k)
    if want_split and total_k >= 2:
        n_split = 2
        kt = -(-total_k // 2)
    else:
        n_split = 1
        kt = total_k
    emit_partial = n_split > 1
    need_mask = (hw_p % tile_k != 0) or (n_split * kt != total_k)

    if n_split * kt == total_k:
        in_map = lambda b, s, j: (b, 0, s * kt + j)
    else:
        # Overflow tiles of the second split are clamped to the last valid
        # block (DMA stays in bounds) and fully masked out in-kernel.
        last_k = total_k - 1
        in_map = lambda b, s, j: (b, 0, jnp.minimum(s * kt + j, last_k))

    in_specs = [pl.BlockSpec((1, c_pad, tile_k), in_map),
                pl.BlockSpec((1, c_pad, tile_k), in_map)]

    if emit_partial:
        out_shape = jax.ShapeDtypeStruct((n, n_split, c_pad, c_pad), jnp.float32)
        out_spec = pl.BlockSpec((1, 1, c_pad, c_pad),
                                lambda b, s, j: (b, s, 0, 0))
    else:
        out_shape = jax.ShapeDtypeStruct((n, 1, 1), jnp.float32)
        out_spec = pl.BlockSpec((1, 1, 1), lambda b, s, j: (b, 0, 0))

    needed_vmem = 4 * c_pad * tile_k * itemsize + acc_bytes + out_buf_bytes
    vmem_limit = int(max(32 << 20, needed_vmem + (2 << 20),
                         min(needed_vmem + (16 << 20), phys_vmem - (4 << 20))))

    kernel = functools.partial(
        _gram_kernel, kt=kt, tile_k=tile_k, hw=hw_p,
        need_mask=need_mask, emit_partial=emit_partial)

    out = pl.pallas_call(
        kernel,
        out_shape=out_shape,
        grid_spec=pltpu.PrefetchScalarGridSpec(
            num_scalar_prefetch=0,
            grid=(n, n_split, kt),
            in_specs=in_specs,
            out_specs=out_spec,
            scratch_shapes=[pltpu.VMEM((c_pad, c_pad), jnp.float32)],
        ),
        compiler_params=pltpu.CompilerParams(
            dimension_semantics=("parallel", "parallel", "arbitrary"),
            vmem_limit_bytes=vmem_limit,
        ),
    )(pred_f, targ_f)

    if emit_partial:
        m = jnp.sum(out, axis=1)                          # (n, c_pad, c_pad)
        sum_abs = 0.5 * jnp.sum(jnp.abs(m + jnp.swapaxes(m, 1, 2)))
    else:
        sum_abs = jnp.sum(out)

    # mean over the (n, c, c) gram-difference tensor, with the 1/(c*h*w) gram
    # normalization and loss_weight hoisted out of the kernel.
    scale = (jnp.float32(loss_weight)
             / jnp.float32(c * h * w)
             / jnp.float32(n * c * c))
    return sum_abs * scale


def _gram_loss_ref(pred, target, loss_weight=1.0):
    n, c, h, w = pred.shape
    f_p = pred.reshape(n, c, h * w).astype(jnp.float32)
    f_t = target.reshape(n, c, h * w).astype(jnp.float32)
    hp = lax.Precision.HIGHEST
    g_p = jnp.einsum('nck,ndk->ncd', f_p, f_p, precision=hp) / (c * h * w)
    g_t = jnp.einsum('nck,ndk->ncd', f_t, f_t, precision=hp) / (c * h * w)
    return loss_weight * jnp.mean(jnp.abs(g_p - g_t))


if __name__ == "__main__":
    key = jax.random.PRNGKey(0)
    k1, k2, k3, k4, k5, k6 = jax.random.split(key, 6)

    # 1) small f32, forced tile_k=128 -> 2 k-steps (accumulation path), N=2.
    pred = jax.random.normal(k1, (2, 4, 16, 16), dtype=jnp.float32)
    targ = jax.random.normal(k2, (2, 4, 16, 16), dtype=jnp.float32)
    out = gram_loss(pred, targ, loss_weight=1.0, tile_k=128)
    jax.block_until_ready(out)
    ref = _gram_loss_ref(pred, targ, loss_weight=1.0)
    assert jnp.allclose(out, ref, rtol=2e-3, atol=1e-6), (out, ref)

    # 2) N=1 -> megacore HW-split (partial-M outputs) with a ragged, masked
    #    tail (17*17 = 289 columns, tile_k=128, odd tile count -> clamped map).
    pred = jax.random.normal(k3, (1, 8, 17, 17), dtype=jnp.float32)
    targ = jax.random.normal(k4, (1, 8, 17, 17), dtype=jnp.float32)
    out = gram_loss(pred, targ, loss_weight=0.5, tile_k=128)
    jax.block_until_ready(out)
    ref = _gram_loss_ref(pred, targ, loss_weight=0.5)
    assert jnp.allclose(out, ref, rtol=2e-3, atol=1e-6), (out, ref)

    # 3) bf16 ingestion (c_pad -> 16) + tiny-spatial pad-to-128 path.
    pred = jax.random.normal(k5, (2, 8, 10, 10), dtype=jnp.bfloat16)
    targ = jax.random.normal(k6, (2, 8, 10, 10), dtype=jnp.bfloat16)
    out = gram_loss(pred, targ, loss_weight=1.0)
    jax.block_until_ready(out)
    ref = _gram_loss_ref(pred, targ, loss_weight=1.0)
    assert jnp.allclose(out, ref, rtol=2e-3, atol=1e-5), (out, ref)

    print("KERNEL_OK")
</pallas_src>

<mosaic_0001>
module attributes {stable_mosaic.version = 11 : i64} {
  func.func @_gram_kernel(%arg0: i32, %arg1: i32, %arg2: i32, %arg3: memref<1x8x128xf32, #tpu.memory_space<vmem>>, %arg4: memref<1x8x128xf32, #tpu.memory_space<vmem>>, %arg5: memref<1x1x1xf32, #tpu.memory_space<vmem>>, %arg6: memref<8x8xf32, #tpu.memory_space<vmem>>) attributes {dimension_semantics = [#tpu.dimension_semantics<parallel>, #tpu.dimension_semantics<parallel>, #tpu.dimension_semantics<arbitrary>], iteration_bounds = array<i64: 2, 1, 2>, scalar_prefetch = 0 : i64, scratch_operands = 1 : i64, tpu.core_type = #tpu.core_type<tc>, window_params = [{transform_indices = @transform_0, window_bounds = array<i64: 1, 8, 128>}, {transform_indices = @transform_1, window_bounds = array<i64: 1, 8, 128>}, {transform_indices = @transform_2, window_bounds = array<i64: 1, 1, 1>}]} {
    %c0 = arith.constant 0 : index
    %c0_0 = arith.constant 0 : index
    %c0_1 = arith.constant 0 : index
    %0 = vector.load %arg3[%c0, %c0_0, %c0_1] : memref<1x8x128xf32, #tpu.memory_space<vmem>>, vector<1x8x128xf32>
    %1 = vector.shape_cast %0 : vector<1x8x128xf32> to vector<8x128xf32>
    %c0_2 = arith.constant 0 : index
    %c0_3 = arith.constant 0 : index
    %c0_4 = arith.constant 0 : index
    %2 = vector.load %arg4[%c0_2, %c0_3, %c0_4] : memref<1x8x128xf32, #tpu.memory_space<vmem>>, vector<1x8x128xf32>
    %3 = vector.shape_cast %2 : vector<1x8x128xf32> to vector<8x128xf32>
    %4 = arith.addf %1, %3 : vector<8x128xf32>
    %5 = arith.subf %1, %3 : vector<8x128xf32>
    %cst = arith.constant dense<0.000000e+00> : vector<8x8xf32>
    %6 = tpu.matmul %4, %5, %cst {dimension_numbers = #tpu.dot_dimension_numbers<[1], [1], [0], [0], [0, 0, 1, 0], [], []>} : vector<8x128xf32>, vector<8x128xf32>, vector<8x8xf32> -> vector<8x8xf32>
    %c0_i32 = arith.constant 0 : i32
    %7 = arith.cmpi eq, %arg2, %c0_i32 : i32
    %8 = arith.extui %7 : i1 to i32
    %c0_i32_5 = arith.constant 0 : i32
    %9 = arith.cmpi ne, %8, %c0_i32_5 : i32
    scf.if %9 {
      %c0_9 = arith.constant 0 : index
      %c0_10 = arith.constant 0 : index
      %16 = vector.load %arg6[%c0_9, %c0_10] : memref<8x8xf32, #tpu.memory_space<vmem>>, vector<8x8xf32>
      tpu.vector_store %arg6[%c0_9, %c0_10], %6 {strides = array<i32>} : memref<8x8xf32, #tpu.memory_space<vmem>>, vector<8x8xf32>,
    } else {
    }
    %c0_i32_6 = arith.constant 0 : i32
    %10 = arith.cmpi sgt, %arg2, %c0_i32_6 : i32
    %11 = arith.extui %10 : i1 to i32
    %c0_i32_7 = arith.constant 0 : i32
    %12 = arith.cmpi ne, %11, %c0_i32_7 : i32
    scf.if %12 {
      %c0_9 = arith.constant 0 : index
      %c0_10 = arith.constant 0 : index
      %16 = vector.load %arg6[%c0_9, %c0_10] : memref<8x8xf32, #tpu.memory_space<vmem>>, vector<8x8xf32>
      %17 = arith.addf %16, %6 : vector<8x8xf32>
      %c0_11 = arith.constant 0 : index
      %c0_12 = arith.constant 0 : index
      %18 = vector.load %arg6[%c0_11, %c0_12] : memref<8x8xf32, #tpu.memory_space<vmem>>, vector<8x8xf32>
      tpu.vector_store %arg6[%c0_11, %c0_12], %17 {strides = array<i32>} : memref<8x8xf32, #tpu.memory_space<vmem>>, vector<8x8xf32>,
    } else {
    }
    %c1_i32 = arith.constant 1 : i32
    %13 = arith.cmpi eq, %arg2, %c1_i32 : i32
    %14 = arith.extui %13 : i1 to i32
    %c0_i32_8 = arith.constant 0 : i32
    %15 = arith.cmpi ne, %14, %c0_i32_8 : i32
    scf.if %15 {
      %c0_9 = arith.constant 0 : index
      %c0_10 = arith.constant 0 : index
      %16 = vector.load %arg6[%c0_9, %c0_10] : memref<8x8xf32, #tpu.memory_space<vmem>>, vector<8x8xf32>
      %17 = tpu.transpose %16, [1, 0] : vector<8x8xf32> -> vector<8x8xf32>
      %18 = arith.addf %16, %17 : vector<8x8xf32>
      %19 = math.absf %18 : vector<8x8xf32>
      %20 = vector.shape_cast %19 : vector<8x8xf32> to vector<1x8x8xf32>
      %cst_11 = arith.constant dense<0.000000e+00> : vector<1xf32>
      %21 = vector.multi_reduction <add>, %20, %cst_11 [1, 2] : vector<1x8x8xf32> to vector<1xf32>
      %22 = vector.shape_cast %21 : vector<1xf32> to vector<1x1x1xf32>
      %23 = vector.extract %22[0, 0, 0] : f32 from vector<1x1x1xf32>
      %cst_12 = arith.constant 5.000000e-01 : f32
      %24 = arith.mulf %cst_12, %23 : f32
      %25 = vector.broadcast %24 : f32 to vector<1x1x1xf32>
      %c0_13 = arith.constant 0 : index
      %c0_14 = arith.constant 0 : index
      %c0_15 = arith.constant 0 : index
      %26 = vector.load %arg5[%c0_13, %c0_14, %c0_15] : memref<1x1x1xf32, #tpu.memory_space<vmem>>, vector<1x1x1xf32>
      tpu.vector_store %arg5[%c0_13, %c0_14, %c0_15], %25 {strides = array<i32>} : memref<1x1x1xf32, #tpu.memory_space<vmem>>, vector<1x1x1xf32>,
    } else {
    }
    return
  }
  func.func @transform_0(%arg0: i32, %arg1: i32, %arg2: i32) -> (i32, i32, i32) {
    %c2_i32 = arith.constant 2 : i32
    %0 = arith.muli %arg1, %c2_i32 : i32
    %1 = arith.addi %0, %arg2 : i32
    %c0_i32 = arith.constant 0 : i32
    %c0_i32_0 = arith.constant 0 : i32
    return %arg0, %c0_i32, %1 : i32, i32, i32
  }
  func.func @transform_1(%arg0: i32, %arg1: i32, %arg2: i32) -> (i32, i32, i32) {
    %c2_i32 = arith.constant 2 : i32
    %0 = arith.muli %arg1, %c2_i32 : i32
    %1 = arith.addi %0, %arg2 : i32
    %c0_i32 = arith.constant 0 : i32
    %c0_i32_0 = arith.constant 0 : i32
    return %arg0, %c0_i32, %1 : i32, i32, i32
  }
  func.func @transform_2(%arg0: i32, %arg1: i32, %arg2: i32) -> (i32, i32, i32) {
    %c0_i32 = arith.constant 0 : i32
    %c0_i32_0 = arith.constant 0 : i32
    %c0_i32_1 = arith.constant 0 : i32
    return %arg0, %c0_i32, %c0_i32_0 : i32, i32, i32
  }
}

</mosaic_0001>

<bundles_post_ra>
// kernel: tpu_custom_call.1
= control target key start
LH: loop header
LB: loop body
LE: loop exit
PB: predicated region body
PF: predicated region fallthrough
CT: control target
= control target key end

     0   :  { %7 = vsyncpa [#allocation4], 0  ;;  %s948_s0 = inlined_call_operand.hbm [shape: f32[2,8,256], index: 0, kind: input, shape index: {}]   ;;  %s949_s1 = inlined_call_operand.hbm [shape: f32[2,8,256], index: 1, kind: input, shape index: {}]   ;;  %s950_s2 = inlined_call_operand.vmem [shape: f32[2,1,1], index: 2, kind: output, shape index: {}]  }
   0x1   :  { %9 = vsyncpa [#allocation4 + $0x1], 0 }
   0x2   :  { %10 = vsyncpa [#allocation6], 0 }
   0x3   :  { %12 = vsyncpa [#allocation6 + $0x1], 0  ;;  %s737_s9 = smov 0   ;;  %s739_s10 = smov 0  }
   0x4   :  { %s741_s11 = smov 0   ;;  %s743_s12 = smov 0  }
   0x5   :  { %s745_s13 = smov 0   ;;  %s747_s14 = smov 0  }
   0x6   :  { %s749_s15 = smov 0   ;;  %s751_s16 = smov 0  }
   0x7 LB: > { %s480_s17 = sadd.s32 4294967295, %s716_s16   ;;  %s30_s18 = sadd.s32 1, %s708_s14  ;;  %s716_s16 = sphi %s751_s16, %s18_s16   ;;  %s712_s15 = sphi %s749_s15, %s966_s15   ;;  %s708_s14 = sphi %s747_s14, %s965_s14   ;;  %s704_s13 = sphi %s745_s13, %s964_s13   ;;  %s700_s12 = sphi %s743_s12, %s963_s12   ;;  %s696_s11 = sphi %s741_s11, %s962_s11   ;;  %s692_s10 = sphi %s739_s10, %s961_s10   ;;  %s688_s9 = sphi %s737_s9, %s960_s9  }
   0x8   : > { %p31_p0 = scmp.ge.s32.totalorder %s30_s18, 2  ;;  %s37_s19 = sadd.s32 1, %s712_s15 }
   0x9   : > { %s50_s20 = sadd.s32 1, %s696_s11  ;;  %p57_p1 = scmp.ne.s32.totalorder %s696_s11, %s692_s10 }
   0xa   : > { %s968_s18 = smov (%p31_p0, %s30_s18), 0  ;;  %s970_s19 = smov (!%p31_p0, %s37_s19), %s712_s15 }
   0xb   : > { %s46_s21 = ssub.s32 %s708_s14, %s968_s18  ;;  %p58_p2 = scmp.eq.s32.totalorder %s716_s16, 0 }
   0xc   : > { %p39_p3 = scmp.ge.s32.totalorder %s970_s19, 2  ;;  %p63_p4 = scmp.ne.s32.totalorder %s692_s10, %s688_s9 }
   0xd   : > { %p788_p5 = por %p58_p2, %p57_p1  ;;  %p64_p6 = scmp.eq.s32.totalorder %s480_s17, 0 }
   0xe   : > { %s972_s19 = smov (%p39_p3, %s970_s19), 0  ;;  %p518_p8 = scmp.lt.s32.totalorder %s716_s16, 4 }
   0xf   : > { %p794_p7 = por %p64_p6, %p63_p4  ;;  %s45_s24 = ssub.s32 %s712_s15, %s972_s19 }
  0x10   : > { %s47_s25 = sor.u32 %s46_s21, %s45_s24  ;;  %s802_s26 = sand.u32 1, %s696_s11  }
  0x11   : > { %s953_s23 = scalar_select %p794_p7, 1, 0 }
  0x12   : > { %p48_p9 = scmp.eq.s32.totalorder %s47_s25, 0  ;;  %s484_s27 = sshll.u32 %s802_s26, 3 }
  0x13   : > { %s485_s28 = sshll.u32 %s712_s15, 1  ;;  %s149_s4 = scalar_lea.vmem [#allocation3], %s484_s27 }
  0x14   : > { %s807_s29 = scalar_select %p48_p9, %s696_s11, %s50_s20  }
  0x15   : > { %s810_s30 = sadd.s32 %s708_s14, %s485_s28  ;;  %s160_s5 = sshll.u32 %s149_s4, 4  ;;  %s822_s5 = int_to_ptr.vmem [resolvable:$true] %s160_s5 }
  0x16   : > { %s486_s3 = sshll.u32 %s810_s30, 7  ;;  %p828_p10 = pnand %p518_p8, %p788_p5 }
  0x17   : > { %s820_s8 = scalar_lea.hbm %s948_s0, %s486_s3  ;;  %s146_s17 = scalar_lea.sflag [#allocation4], %s802_s26 }
  0x18   : > { %s586_s20 = scalar_lea.hbm %s820_s8, 128  ;;  %p588_p0 = pneg %p828_p10 }
  0x19   : > { %p587_p13 = scmp.ne.s32.totalorder %s820_s8, %s586_s20  ;;  %s591_s24 = scalar_lea.hbm %s948_s0, 512 }
  0x1a   : > { %p592_p3 = scmp.lt.u32.totalorder %s820_s8, %s948_s0  ;;  %p593_p4 = scmp.lt.u32.totalorder %s591_s24, %s586_s20 }
  0x1b   : > { %p589_p1 = pnand %p588_p0, %p587_p13  ;;  %p595_p6 = scmp.lt.u32.totalorder %s586_s20, %s820_s8 }
  0x1c   : > { %p594_p5 = por %p593_p4, %p592_p3 }
  0x1d   : > { %p590_p2 = pneg %p589_p1 }
  0x1e   : > { %p596_p8 = por %p595_p6, %p594_p5 }
  0x20   : > { %p597_p9 = pnand %p596_p8, %p590_p2 }
  0x22   : > { %600 = shalt.err (!%p597_p9)
}
  0x23   : > { %s601_s4 = scalar_lea.vmem %s822_s5, 128  ;;  %s718_s6 = smov [#allocation3]  }
  0x24   : > { %p602_p13 = scmp.ne.s32.totalorder %s822_s5, %s601_s4  ;;  %s606_s7 = sshll.u32 %s718_s6, 4  ;;  %s607_s7 = int_to_ptr.vmem [resolvable:$false] %s606_s7 }
  0x25   : > { %s608_s21 = scalar_lea.vmem %s607_s7, 256  ;;  %p609_p12 = scmp.lt.s32.totalorder %s822_s5, %s607_s7 }
  0x26   : > { %p604_p1 = pnand %p602_p13, %p588_p0  ;;  %p610_p3 = scmp.lt.s32.totalorder %s608_s21, %s601_s4 }
  0x28   : > { %p605_p11 = pneg %p604_p1  ;;  %p611_p4 = por %p610_p3, %p609_p12 }
  0x2a   : > { %p612_p5 = pnand %p611_p4, %p605_p11 }
  0x2c   : > { %615 = shalt.err (!%p612_p5)
}
  0x2d   : > { %514 = dma.hbm_to_vmem [thread:$0]  (!%p828_p10), %s820_s8, 128, %s822_s5, %s146_s17  }
  0x2e   : > { %p955_p2 = scmp.lt.s32.totalorder %s716_s16, 5  ;;  %p956_p6 = scmp.ge.s32.totalorder %s716_s16, 1 }
  0x2f   : > { %s873_s25 = scalar_lea.hbm %s949_s1, %s486_s3  ;;  %s171_s28 = scalar_lea.vmem [#allocation5], %s484_s27 }
  0x30   : > { %p864_p8 = pnand %p956_p6, %p955_p2  ;;  %s182_s4 = sshll.u32 %s171_s28, 4  ;;  %s183_s4 = int_to_ptr.vmem [resolvable:$true] %s182_s4 }
  0x31   : > { %s168_s5 = scalar_lea.sflag [#allocation6], %s802_s26  ;;  %s616_s8 = scalar_lea.hbm %s873_s25, 128 }
  0x32   : > { %s957_s20 = scalar_select %p864_p8, 1, 0 }
  0x33   : > { %p617_p11 = scmp.ne.s32.totalorder %s873_s25, %s616_s8  ;;  %s621_s3 = scalar_lea.hbm %s949_s1, 512 }
  0x34   : > { %p622_p13 = scmp.lt.u32.totalorder %s873_s25, %s949_s1  ;;  %p623_p1 = scmp.lt.u32.totalorder %s621_s3, %s616_s8 }
  0x35   : > { %p619_p12 = pnand %p617_p11, %p588_p0  ;;  %p625_p4 = scmp.lt.u32.totalorder %s616_s8, %s873_s25 }
  0x36   : > { %p624_p3 = por %p623_p1, %p622_p13 }
  0x37   : > { %p620_p9 = pneg %p619_p12 }
  0x38   : > { %p626_p5 = por %p625_p4, %p624_p3 }
  0x3a   : > { %p627_p2 = pnand %p626_p5, %p620_p9 }
  0x3c   : > { %630 = shalt.err (!%p627_p2)
}
  0x3d   : > { %s631_s26 = scalar_lea.vmem %s183_s4, 128  ;;  %s719_s27 = smov [#allocation5]  }
  0x3e   : > { %p632_p6 = scmp.ne.s32.totalorder %s183_s4, %s631_s26  ;;  %s636_s21 = sshll.u32 %s719_s27, 4  ;;  %s637_s21 = int_to_ptr.vmem [resolvable:$false] %s636_s21 }
  0x3f   : > { %s638_s22 = scalar_lea.vmem %s637_s21, 256  ;;  %p639_p7 = scmp.lt.s32.totalorder %s183_s4, %s637_s21 }
  0x40   : > { %p634_p11 = pnand %p632_p6, %p588_p0  ;;  %p640_p8 = scmp.lt.s32.totalorder %s638_s22, %s631_s26 }
  0x42   : > { %p635_p12 = pneg %p634_p11  ;;  %p641_p1 = por %p640_p8, %p639_p7 }
  0x44   : > { %p642_p13 = pnand %p641_p1, %p635_p12 }
  0x46   : > { %645 = shalt.err (!%p642_p13)
}
  0x47   : > { %517 = dma.hbm_to_vmem [thread:$0]  (!%p828_p10), %s873_s25, 128, %s183_s4, %s168_s5  }
  0x48   : > { %p958_p9 = scmp.ne.s32.totalorder %s957_s20, 0 }
  0x49   : > { %s193_s24 = sand.u32 (!%p958_p9), 1, %s692_s10   ;;  %p959_p0 = scmp.ne.s32.totalorder (!%p958_p9), %s953_s23, 0 }
  0x4a   : > { %191 = sbr.rel (%p958_p9) target bundleno = 662 (0x296), region = 28  ;;  %s491_s28 = sshll.u32 (!%p958_p9), %s193_s24, 3 }
  0x4b   : > { %s194_s8 = scalar_lea.sflag (!%p958_p9), [#allocation4], %s193_s24  ;;  %s197_s30 = scalar_lea.vmem (!%p958_p9), [#allocation3], %s491_s28 }
  0x51   : > { %679 = dma.done.wait (%p959_p0), %s194_s8, 128  }
  0x52   : > { %681 = vsyncadd (%p959_p0), %s194_s8, 4294967168  ;;  %s203_s17 = scalar_lea.sflag [#allocation6], %s193_s24  ;;  %s206_s3 = scalar_lea.vmem [#allocation5], %s491_s28 }
  0x53   : > { %683 = dma.done.wait (%p959_p0), %s203_s17, 128  }
  0x54   : > { %685 = vsyncadd (%p959_p0), %s203_s17, 4294967168  ;;  %p234_p7 = scmp.lt.s32.totalorder %s704_s13, 1  ;;  %v720_v0 = vmov 0.0   ;;  %vm721_vm0 = vmmov 0   ;;  %v237_v1 = vld [vmem:[%s197_s30] sm:$0xff]  ;;  %v238_v2 = vld [vmem:[%s206_s3] sm:$0xff] }
  0x55   : > { %500 = vmatprep.subr.mxu0 %v720_v0  ;;  %502 = vmatprep.mubr.msk.f32.mxu0 %vm721_vm0, %v720_v0  ;;  %v240_v3 = vsub.f32 %v237_v1, %v238_v2  ;;  %v239_v4 = vadd.f32 %v238_v2, %v237_v1  ;;  %p493_p10 = scmp.ne.s32.totalorder %s700_s12, 0 }
  0x56   : > { %s974_s13 = smov (!%p234_p7, %s704_s13), 1  ;;  %vm315_vm1 = vcmask (!%p493_p10), 64512  }
  0x57   : > { %s236_s25 = scalar_lea.vmem %s950_s2, %s974_s13  ;;  %501 = vmatpush3.xpose.msra.mxu0 %v240_v3 }
  0x5a   : > { %503 = vmatmul.mubr.f32.vlgmr.msra.gmra.mrb[0].mxu0 %v239_v4 }
 0x128   : > { %314 = sbr.rel (%p493_p10) target bundleno = 303 (0x12f), region = 40 }
 0x12d   : > { %v307_v5 = vpop.f32.mrb[0].mxu0 }
 0x12e   : > { %v504_v6 = vpop.f32.mrb[1].mxu0  ;;  %316 = vst.msk [vmem:[#allocation2] sm:$0xff] (!%p493_p10), %vm315_vm1, %v307_v5 }
 0x12f PF: > { %p494_p8 = scmp.le.s32.totalorder %s700_s12, 0 }
 0x130   : > { %vm323_vm2 = vcmask (!%p494_p8), 64512  }
 0x131   : > { %320 = sbr.rel (%p494_p8) target bundleno = 313 (0x139), region = 44 }
 0x135   : > { %v321_v7 = vld [vmem:[#allocation2] sm:$0xff] (!%p494_p8) }
 0x136   : > { %v322_v8 = vadd.f32 (!%p494_p8), %v321_v7, %v307_v5 }
 0x138   : > { %324 = vst.msk [vmem:[#allocation2] sm:$0xff] %vm323_vm2, %v322_v8 }
 0x139 PF: > { %p495_p3 = scmp.ne.s32.totalorder %s700_s12, 1 }
 0x13a   : > { %vm364_vm3 = vcmask (!%p495_p3), 64512   ;;  %vm377_vm4 = vcmask (!%p495_p3), 0  }
 0x13b   : > { %328 = sbr.rel (%p495_p3) target bundleno = 662 (0x296), region = 48 }
 0x13f   : > { %v329_v9 = vld [vmem:[#allocation2] sm:$0xff] (!%p495_p3) }
 0x140   : > { %330 = vxpose.xlu0.b32.start.end [1/1] (short) (narrow) (!%p495_p3), %v329_v9, 8 }
 0x1c0   : > { %v346_v10 = vpop.trf.xlu0 }
 0x1c1   : > { %v362_v11 = vadd.f32 %v346_v10, %v329_v9 }
 0x1c3   : > { %v363_v12 = vand.u32 2147483647, %v362_v11 }
 0x1c5   : > { %v365_v13 = vsel %vm364_vm3, %v363_v12, 0.0 }
 0x1c6   : > { %366 = vadd.xlane.f32.xlu0 %v365_v13 }
 0x253   : > { %v367_v14 = vpop.xlane.xlu0 %366 }
 0x254   : > { %v368_v15 = vrot.slane %v367_v14, 4 }
 0x256   : > { %v369_v16 = vadd.f32 %v368_v15, %v367_v14 }
 0x258   : > { %v370_v17 = vrot.slane %v369_v16, 2 }
 0x25a   : > { %v371_v18 = vadd.f32 %v370_v17, %v369_v16 }
 0x25c   : > { %v372_v19 = vrot.slane %v371_v18, 1 }
 0x25e   : > { %v373_v20 = vadd.f32 %v372_v19, %v371_v18 }
 0x260   : > { %505 = vpush %v373_v20 }
 0x291   : > { %s506_s23 = spop %505 }
 0x292   : > { %s375_s12 = smul.f32 0.5, %s506_s23 }
 0x294   : > { %v376_v21 = vstv %s375_s12 }
 0x295   : > { %378 = vst.msk [vmem:[%s236_s25] sm:$0x1] %vm377_vm4, %v376_v21 }
 0x296 PF: > { %s18_s16 = sadd.s32 1, %s716_s16   ;;  %s960_s9 = smov %s692_s10 }
 0x297   : > { %p15_p4 = scmp.ge.s32.totalorder %s18_s16, 6   ;;  %s961_s10 = smov %s696_s11 }
 0x298   : > { %s962_s11 = smov %s807_s29  ;;  %s963_s12 = smov %s708_s14 }
 0x299   : > { %s964_s13 = smov %s712_s15  ;;  %s965_s14 = smov %s968_s18 }
 0x29a   : > { %s966_s15 = smov %s972_s19  ;;  %17 = sbr.rel (!%p15_p4) target bundleno = 7 (0x7), region = 93 }
 0x2a1   :  { %396 = vsyncpa [#allocation4], 1 }
 0x2a2   :  { %398 = vsyncpa [#allocation4 + $0x1], 1 }
 0x2a3   :  { %399 = vsyncpa [#allocation6], 1 }
 0x2a4   :  { %401 = vsyncpa [#allocation6 + $0x1], 1 }

</bundles_post_ra>
